<compile_context>
chip_gen: v5e
topology: v5e:2x2
jax: 0.10.0
libtpu: 0.0.40
codegen_flags: <defaults>
</compile_context>

<pallas_src>
import functools

import jax
import jax.numpy as jnp
from jax.experimental import pallas as pl
from jax.experimental.pallas import tpu as pltpu

SCALE = 20.0
_EPS = 1e-12          # F.normalize eps
_NEG_INF = -1e30      # finite "masked" logit (avoids inf-inf hazards)


def _round_up(x, m):
    return ((x + m - 1) // m) * m


def _mnrl_kernel(a_ref, c_ref, out_ref,
                 a_sc, m_sc, l_sc, diag_sc, *,
                 n_valid_rows, n_valid_cols, tile, scale,
                 mask_cols, mask_rows, compute_dtype):
    i = pl.program_id(0)          # anchor-row block (parallel)
    j = pl.program_id(1)          # candidate block (reduction axis)
    nj = pl.num_programs(1)
    eps2 = jnp.float32(_EPS * _EPS)

    # ---- per-row-block init (first candidate step) -------------------------
    @pl.when(j == 0)
    def _init():
        a = a_ref[...].astype(jnp.float32)
        inv_a = jax.lax.rsqrt(
            jnp.maximum(jnp.sum(a * a, axis=1, keepdims=True), eps2))
        # Fold the similarity scale into the resident anchor tile once.
        a_sc[...] = (a * (inv_a * jnp.float32(scale))).astype(compute_dtype)
        m_sc[...] = jnp.full_like(m_sc, _NEG_INF)
        l_sc[...] = jnp.zeros_like(l_sc)
        diag_sc[...] = jnp.zeros_like(diag_sc)

    # ---- current candidate tile: normalize (f32 math), cast for the MXU ----
    c = c_ref[...].astype(jnp.float32)
    inv_c = jax.lax.rsqrt(
        jnp.maximum(jnp.sum(c * c, axis=1, keepdims=True), eps2))
    c_cd = (c * inv_c).astype(compute_dtype)

    # ---- scores tile: contract on D directly (no explicit transpose) -------
    s = jax.lax.dot_general(
        a_sc[...], c_cd,
        dimension_numbers=(((1,), (1,)), ((), ())),
        preferred_element_type=jnp.float32)            # (tile, tile)

    if mask_cols:
        col = jax.lax.broadcasted_iota(jnp.int32, (1, tile), 1)
        s = jnp.where(j * tile + col < n_valid_cols, s, _NEG_INF)

    # ---- diagonal (positive) logits: pulled out of the MXU tile at j == i --
    @pl.when(j == i)
    def _diag():
        row = jax.lax.broadcasted_iota(jnp.int32, (tile, tile), 0)
        col = jax.lax.broadcasted_iota(jnp.int32, (tile, tile), 1)
        diag_sc[...] = jnp.sum(jnp.where(row == col, s, 0.0),
                               axis=1, keepdims=True)

    # ---- online logsumexp update --------------------------------------------
    m_prev = m_sc[...]
    m_new = jnp.maximum(m_prev, jnp.max(s, axis=1, keepdims=True))
    alpha = jnp.exp(m_prev - m_new)
    l_sc[...] = alpha * l_sc[...] + jnp.sum(jnp.exp(s - m_new),
                                            axis=1, keepdims=True)
    m_sc[...] = m_new

    # ---- finalize: per-row-block partial loss into SMEM --------------------
    @pl.when(j == nj - 1)
    def _fin():
        lse = m_sc[...] + jnp.log(l_sc[...])            # (tile, 1)
        per_row = lse - diag_sc[...]
        if mask_rows:
            row = jax.lax.broadcasted_iota(jnp.int32, (tile, 1), 0)
            per_row = jnp.where(i * tile + row < n_valid_rows, per_row, 0.0)
        out_ref[0, 0] = jnp.sum(per_row)


def multiple_negatives_ranking_loss(anchor_reps, positive_reps,
                                    negative_reps=None, *,
                                    scale=SCALE, tile=None,
                                    compute_dtype=jnp.bfloat16):
    """JAX/Pallas forward of MultipleNegativesRankingLoss. Returns scalar f32."""
    B, D = anchor_reps.shape
    assert positive_reps.shape == (B, D)

    # Build the candidate matrix once (positives first, then negatives).
    if negative_reps is None:
        cand = positive_reps
    else:
        assert negative_reps.shape[1] == D
        cand = jnp.concatenate([positive_reps, negative_reps], axis=0)
    C = cand.shape[0]

    if tile is None:
        tile = min(128, _round_up(B, 8))
    tile = max(8, int(tile))

    # --- pad so every block is full; masking happens inside the kernel ------
    B_pad = _round_up(B, tile)
    C_pad = _round_up(C, tile)
    a = anchor_reps
    if B_pad != B:
        a = jnp.pad(a, ((0, B_pad - B), (0, 0)))
    if C_pad != C:
        cand = jnp.pad(cand, ((0, C_pad - C), (0, 0)))

    num_i = B_pad // tile
    num_j = C_pad // tile

    kernel = functools.partial(
        _mnrl_kernel,
        n_valid_rows=B, n_valid_cols=C,
        tile=tile, scale=float(scale),
        mask_cols=(C_pad != C), mask_rows=(B_pad != B),
        compute_dtype=compute_dtype)

    itemsize = jnp.dtype(anchor_reps.dtype).itemsize
    cost = pl.CostEstimate(
        flops=int(2 * B_pad * C_pad * D),
        transcendentals=int(B_pad * C_pad),
        bytes_accessed=int((a.size + num_i * cand.size) * itemsize + num_i * 4))

    partial_losses = pl.pallas_call(
        kernel,
        out_shape=jax.ShapeDtypeStruct((num_i, 1), jnp.float32),
        grid_spec=pltpu.PrefetchScalarGridSpec(
            num_scalar_prefetch=0,
            grid=(num_i, num_j),
            in_specs=[
                # anchor tile resident across the whole candidate sweep
                pl.BlockSpec((tile, D), lambda i, j: (i, 0)),
                # candidate blocks stream along j
                pl.BlockSpec((tile, D), lambda i, j: (j, 0)),
            ],
            out_specs=pl.BlockSpec((1, 1), lambda i, j: (i, 0),
                                   memory_space=pltpu.SMEM),
            scratch_shapes=[
                pltpu.VMEM((tile, D), compute_dtype),   # scaled+normalized anchor
                pltpu.VMEM((tile, 1), jnp.float32),     # running max
                pltpu.VMEM((tile, 1), jnp.float32),     # running sum
                pltpu.VMEM((tile, 1), jnp.float32),     # diagonal logits
            ]),
        compiler_params=pltpu.CompilerParams(
            dimension_semantics=("parallel", "arbitrary")),
        cost_estimate=cost,
    )(a, cand)

    return jnp.sum(partial_losses) / jnp.float32(B)


def _reference(a, p, n=None):
    """Pure-JAX reference (same math, outside Pallas)."""
    b = p if n is None else jnp.concatenate([p, n], axis=0)
    an = a / jnp.maximum(jnp.linalg.norm(a, axis=1, keepdims=True), _EPS)
    bn = b / jnp.maximum(jnp.linalg.norm(b, axis=1, keepdims=True), _EPS)
    s = (an @ bn.T) * SCALE
    lse = jax.scipy.special.logsumexp(s, axis=1)
    diag = jnp.sum(an * bn[: a.shape[0]], axis=1) * SCALE
    return jnp.mean(lse - diag)


if __name__ == "__main__":
    key = jax.random.PRNGKey(0)
    k_a, k_p, k_n = jax.random.split(key, 3)

    # 1) exact-fit shapes, f32 MXU path (tight numerical check)
    B, D, N_NEG = 8, 32, 8
    anchor = jax.random.normal(k_a, (B, D), dtype=jnp.float32)
    positive = jax.random.normal(k_p, (B, D), dtype=jnp.float32)
    negative = jax.random.normal(k_n, (N_NEG, D), dtype=jnp.float32)

    ref = _reference(anchor, positive, negative)

    loss_f32 = multiple_negatives_ranking_loss(
        anchor, positive, negative, compute_dtype=jnp.float32)
    jax.block_until_ready(loss_f32)
    assert jnp.allclose(loss_f32, ref, atol=1e-4, rtol=1e-4), (loss_f32, ref)

    # 2) default bf16-MXU path (loss-level tolerance)
    loss_bf16 = multiple_negatives_ranking_loss(anchor, positive, negative)
    jax.block_until_ready(loss_bf16)
    assert jnp.allclose(loss_bf16, ref, atol=5e-2, rtol=5e-2), (loss_bf16, ref)

    # 3) ragged shapes -> exercises row/col padding + masking
    a2 = jax.random.normal(jax.random.PRNGKey(1), (12, D), dtype=jnp.float32)
    p2 = jax.random.normal(jax.random.PRNGKey(2), (12, D), dtype=jnp.float32)
    n2 = jax.random.normal(jax.random.PRNGKey(3), (5, D), dtype=jnp.float32)
    loss_rag = multiple_negatives_ranking_loss(a2, p2, n2,
                                               compute_dtype=jnp.float32)
    jax.block_until_ready(loss_rag)
    ref2 = _reference(a2, p2, n2)
    assert jnp.allclose(loss_rag, ref2, atol=1e-4, rtol=1e-4), (loss_rag, ref2)

    # 4) no explicit negatives (positives only)
    loss_nn = multiple_negatives_ranking_loss(anchor, positive,
                                              compute_dtype=jnp.float32)
    jax.block_until_ready(loss_nn)
    ref3 = _reference(anchor, positive, None)
    assert jnp.allclose(loss_nn, ref3, atol=1e-4, rtol=1e-4), (loss_nn, ref3)

    print("KERNEL_OK")
</pallas_src>

<mosaic_0001>
module attributes {stable_mosaic.version = 11 : i64} {
  func.func @_mnrl_kernel(%arg0: i32, %arg1: i32, %arg2: memref<8x32xf32, #tpu.memory_space<vmem>>, %arg3: memref<8x32xf32, #tpu.memory_space<vmem>>, %arg4: memref<1x1xf32, #tpu.memory_space<smem>>, %arg5: memref<8x32xf32, #tpu.memory_space<vmem>>, %arg6: memref<8x1xf32, #tpu.memory_space<vmem>>, %arg7: memref<8x1xf32, #tpu.memory_space<vmem>>, %arg8: memref<8x1xf32, #tpu.memory_space<vmem>>) attributes {dimension_semantics = [#tpu.dimension_semantics<parallel>, #tpu.dimension_semantics<arbitrary>], iteration_bounds = array<i64: 1, 2>, scalar_prefetch = 0 : i64, scratch_operands = 4 : i64, tpu.core_type = #tpu.core_type<tc>, window_params = [{transform_indices = @transform_0, window_bounds = array<i64: 8, 32>}, {transform_indices = @transform_1, window_bounds = array<i64: 8, 32>}, {transform_indices = @transform_2, window_bounds = array<i64: 1, 1>}]} {
    %c0_i32 = arith.constant 0 : i32
    %0 = arith.cmpi eq, %arg1, %c0_i32 : i32
    %1 = arith.extui %0 : i1 to i32
    %cst = arith.constant 1.000000e-24 : f32
    %c0_i32_0 = arith.constant 0 : i32
    %2 = arith.cmpi ne, %1, %c0_i32_0 : i32
    scf.if %2 {
      %c0_19 = arith.constant 0 : index
      %c0_20 = arith.constant 0 : index
      %36 = vector.load %arg2[%c0_19, %c0_20] : memref<8x32xf32, #tpu.memory_space<vmem>>, vector<8x32xf32>
      %37 = arith.mulf %36, %36 : vector<8x32xf32>
      %cst_21 = arith.constant dense<0.000000e+00> : vector<8xf32>
      %38 = vector.multi_reduction <add>, %37, %cst_21 [1] : vector<8x32xf32> to vector<8xf32>
      %39 = vector.shape_cast %38 : vector<8xf32> to vector<8x1xf32>
      %40 = vector.broadcast %cst : f32 to vector<8x1xf32>
      %41 = arith.maximumf %39, %40 : vector<8x1xf32>
      %42 = math.rsqrt %41 : vector<8x1xf32>
      %cst_22 = arith.constant 2.000000e+01 : f32
      %43 = vector.broadcast %cst_22 : f32 to vector<8x1xf32>
      %44 = arith.mulf %42, %43 : vector<8x1xf32>
      %45 = vector.broadcast %44 : vector<8x1xf32> to vector<8x32xf32>
      %46 = arith.mulf %36, %45 : vector<8x32xf32>
      %c0_23 = arith.constant 0 : index
      %c0_24 = arith.constant 0 : index
      %47 = vector.load %arg5[%c0_23, %c0_24] : memref<8x32xf32, #tpu.memory_space<vmem>>, vector<8x32xf32>
      tpu.vector_store %arg5[%c0_23, %c0_24], %46 {strides = array<i32>} : memref<8x32xf32, #tpu.memory_space<vmem>>, vector<8x32xf32>,
      %cst_25 = arith.constant -1.000000e+30 : f32
      %48 = vector.broadcast %cst_25 : f32 to vector<8x1xf32>
      %c0_26 = arith.constant 0 : index
      %c0_27 = arith.constant 0 : index
      %49 = vector.load %arg6[%c0_26, %c0_27] : memref<8x1xf32, #tpu.memory_space<vmem>>, vector<8x1xf32>
      tpu.vector_store %arg6[%c0_26, %c0_27], %48 {strides = array<i32>} : memref<8x1xf32, #tpu.memory_space<vmem>>, vector<8x1xf32>,
      %cst_28 = arith.constant 0.000000e+00 : f32
      %50 = vector.broadcast %cst_28 : f32 to vector<8x1xf32>
      %c0_29 = arith.constant 0 : index
      %c0_30 = arith.constant 0 : index
      %51 = vector.load %arg7[%c0_29, %c0_30] : memref<8x1xf32, #tpu.memory_space<vmem>>, vector<8x1xf32>
      tpu.vector_store %arg7[%c0_29, %c0_30], %50 {strides = array<i32>} : memref<8x1xf32, #tpu.memory_space<vmem>>, vector<8x1xf32>,
      %cst_31 = arith.constant 0.000000e+00 : f32
      %52 = vector.broadcast %cst_31 : f32 to vector<8x1xf32>
      %c0_32 = arith.constant 0 : index
      %c0_33 = arith.constant 0 : index
      %53 = vector.load %arg8[%c0_32, %c0_33] : memref<8x1xf32, #tpu.memory_space<vmem>>, vector<8x1xf32>
      tpu.vector_store %arg8[%c0_32, %c0_33], %52 {strides = array<i32>} : memref<8x1xf32, #tpu.memory_space<vmem>>, vector<8x1xf32>,
    } else {
    }
    %c0 = arith.constant 0 : index
    %c0_1 = arith.constant 0 : index
    %3 = vector.load %arg3[%c0, %c0_1] : memref<8x32xf32, #tpu.memory_space<vmem>>, vector<8x32xf32>
    %4 = arith.mulf %3, %3 : vector<8x32xf32>
    %cst_2 = arith.constant dense<0.000000e+00> : vector<8xf32>
    %5 = vector.multi_reduction <add>, %4, %cst_2 [1] : vector<8x32xf32> to vector<8xf32>
    %6 = vector.shape_cast %5 : vector<8xf32> to vector<8x1xf32>
    %cst_3 = arith.constant 1.000000e-24 : f32
    %7 = vector.broadcast %cst_3 : f32 to vector<8x1xf32>
    %8 = arith.maximumf %6, %7 : vector<8x1xf32>
    %9 = math.rsqrt %8 : vector<8x1xf32>
    %10 = vector.broadcast %9 : vector<8x1xf32> to vector<8x32xf32>
    %11 = arith.mulf %3, %10 : vector<8x32xf32>
    %c0_4 = arith.constant 0 : index
    %c0_5 = arith.constant 0 : index
    %12 = vector.load %arg5[%c0_4, %c0_5] : memref<8x32xf32, #tpu.memory_space<vmem>>, vector<8x32xf32>
    %cst_6 = arith.constant dense<0.000000e+00> : vector<8x8xf32>
    %13 = tpu.matmul %12, %11, %cst_6 {dimension_numbers = #tpu.dot_dimension_numbers<[1], [1], [0], [0], [0, 0, 1, 0], [], []>} : vector<8x32xf32>, vector<8x32xf32>, vector<8x8xf32> -> vector<8x8xf32>
    %14 = arith.cmpi eq, %arg1, %arg0 : i32
    %15 = arith.extui %14 : i1 to i32
    %c0_i32_7 = arith.constant 0 : i32
    %16 = arith.cmpi ne, %15, %c0_i32_7 : i32
    scf.if %16 {
      %36 = tpu.iota {dimensions = array<i32: 0>} : vector<8x8xi32>
      %37 = tpu.iota {dimensions = array<i32: 1>} : vector<8x8xi32>
      %38 = arith.cmpi eq, %36, %37 : vector<8x8xi32>
      %cst_19 = arith.constant 0.000000e+00 : f32
      %39 = vector.broadcast %cst_19 : f32 to vector<8x8xf32>
      %40 = arith.select %38, %13, %39 : vector<8x8xi1>, vector<8x8xf32>
      %cst_20 = arith.constant dense<0.000000e+00> : vector<8xf32>
      %41 = vector.multi_reduction <add>, %40, %cst_20 [1] : vector<8x8xf32> to vector<8xf32>
      %42 = vector.shape_cast %41 : vector<8xf32> to vector<8x1xf32>
      %c0_21 = arith.constant 0 : index
      %c0_22 = arith.constant 0 : index
      %43 = vector.load %arg8[%c0_21, %c0_22] : memref<8x1xf32, #tpu.memory_space<vmem>>, vector<8x1xf32>
      tpu.vector_store %arg8[%c0_21, %c0_22], %42 {strides = array<i32>} : memref<8x1xf32, #tpu.memory_space<vmem>>, vector<8x1xf32>,
    } else {
    }
    %c0_8 = arith.constant 0 : index
    %c0_9 = arith.constant 0 : index
    %17 = vector.load %arg6[%c0_8, %c0_9] : memref<8x1xf32, #tpu.memory_space<vmem>>, vector<8x1xf32>
    %cst_10 = arith.constant dense<0xFF800000> : vector<8xf32>
    %18 = vector.multi_reduction <maximumf>, %13, %cst_10 [1] : vector<8x8xf32> to vector<8xf32>
    %19 = vector.shape_cast %18 : vector<8xf32> to vector<8x1xf32>
    %20 = arith.maximumf %17, %19 : vector<8x1xf32>
    %21 = arith.subf %17, %20 : vector<8x1xf32>
    %22 = math.exp %21 : vector<8x1xf32>
    %c0_11 = arith.constant 0 : index
    %c0_12 = arith.constant 0 : index
    %23 = vector.load %arg7[%c0_11, %c0_12] : memref<8x1xf32, #tpu.memory_space<vmem>>, vector<8x1xf32>
    %24 = arith.mulf %22, %23 : vector<8x1xf32>
    %25 = vector.broadcast %20 : vector<8x1xf32> to vector<8x8xf32>
    %26 = arith.subf %13, %25 : vector<8x8xf32>
    %27 = math.exp %26 : vector<8x8xf32>
    %cst_13 = arith.constant dense<0.000000e+00> : vector<8xf32>
    %28 = vector.multi_reduction <add>, %27, %cst_13 [1] : vector<8x8xf32> to vector<8xf32>
    %29 = vector.shape_cast %28 : vector<8xf32> to vector<8x1xf32>
    %30 = arith.addf %24, %29 : vector<8x1xf32>
    %c0_14 = arith.constant 0 : index
    %c0_15 = arith.constant 0 : index
    %31 = vector.load %arg7[%c0_14, %c0_15] : memref<8x1xf32, #tpu.memory_space<vmem>>, vector<8x1xf32>
    tpu.vector_store %arg7[%c0_14, %c0_15], %30 {strides = array<i32>} : memref<8x1xf32, #tpu.memory_space<vmem>>, vector<8x1xf32>,
    %c0_16 = arith.constant 0 : index
    %c0_17 = arith.constant 0 : index
    %32 = vector.load %arg6[%c0_16, %c0_17] : memref<8x1xf32, #tpu.memory_space<vmem>>, vector<8x1xf32>
    tpu.vector_store %arg6[%c0_16, %c0_17], %20 {strides = array<i32>} : memref<8x1xf32, #tpu.memory_space<vmem>>, vector<8x1xf32>,
    %c1_i32 = arith.constant 1 : i32
    %33 = arith.cmpi eq, %arg1, %c1_i32 : i32
    %34 = arith.extui %33 : i1 to i32
    %c0_i32_18 = arith.constant 0 : i32
    %35 = arith.cmpi ne, %34, %c0_i32_18 : i32
    scf.if %35 {
      %c0_19 = arith.constant 0 : index
      %c0_20 = arith.constant 0 : index
      %36 = vector.load %arg6[%c0_19, %c0_20] : memref<8x1xf32, #tpu.memory_space<vmem>>, vector<8x1xf32>
      %c0_21 = arith.constant 0 : index
      %c0_22 = arith.constant 0 : index
      %37 = vector.load %arg7[%c0_21, %c0_22] : memref<8x1xf32, #tpu.memory_space<vmem>>, vector<8x1xf32>
      %38 = math.log %37 : vector<8x1xf32>
      %39 = arith.addf %36, %38 : vector<8x1xf32>
      %c0_23 = arith.constant 0 : index
      %c0_24 = arith.constant 0 : index
      %40 = vector.load %arg8[%c0_23, %c0_24] : memref<8x1xf32, #tpu.memory_space<vmem>>, vector<8x1xf32>
      %41 = arith.subf %39, %40 : vector<8x1xf32>
      %42 = vector.shape_cast %41 : vector<8x1xf32> to vector<1x8x1xf32>
      %cst_25 = arith.constant dense<0.000000e+00> : vector<1xf32>
      %43 = vector.multi_reduction <add>, %42, %cst_25 [1, 2] : vector<1x8x1xf32> to vector<1xf32>
      %44 = vector.shape_cast %43 : vector<1xf32> to vector<1x1x1xf32>
      %45 = vector.extract %44[0, 0, 0] : f32 from vector<1x1x1xf32>
      %c0_26 = arith.constant 0 : index
      %c0_27 = arith.constant 0 : index
      %46 = memref.load %arg4[%c0_26, %c0_27] : memref<1x1xf32, #tpu.memory_space<smem>>
      memref.store %45, %arg4[%c0_26, %c0_27] : memref<1x1xf32, #tpu.memory_space<smem>>
    } else {
    }
    return
  }
  func.func @transform_0(%arg0: i32, %arg1: i32) -> (i32, i32) {
    %c0_i32 = arith.constant 0 : i32
    %c0_i32_0 = arith.constant 0 : i32
    return %arg0, %c0_i32 : i32, i32
  }
  func.func @transform_1(%arg0: i32, %arg1: i32) -> (i32, i32) {
    %c0_i32 = arith.constant 0 : i32
    %c0_i32_0 = arith.constant 0 : i32
    return %arg1, %c0_i32 : i32, i32
  }
  func.func @transform_2(%arg0: i32, %arg1: i32) -> (i32, i32) {
    %c0_i32 = arith.constant 0 : i32
    %c0_i32_0 = arith.constant 0 : i32
    return %arg0, %c0_i32 : i32, i32
  }
}

</mosaic_0001>

<bundles_post_ra>
// kernel: tpu_custom_call.1
= control target key start
LH: loop header
LB: loop body
LE: loop exit
PB: predicated region body
PF: predicated region fallthrough
CT: control target
= control target key end

     0   :  { %7 = vsyncpa [#allocation7], 0  ;;  %s804_s0 = inlined_call_operand.hbm [shape: f32[8,32], index: 0, kind: input, shape index: {}]   ;;  %s805_s1 = inlined_call_operand.hbm [shape: f32[16,32], index: 1, kind: input, shape index: {}]   ;;  %s806_s2 = inlined_call_operand.hbm [shape: f32[1,1], index: 2, kind: output, shape index: {}]  }
   0x1   :  { %8 = vsyncpa [#allocation10], 0 }
   0x2   :  { %10 = vsyncpa [#allocation10 + $0x1], 0 }
   0x3   :  { %11 = vsyncpa [#allocation8], 0  ;;  %s670_s9 = smov 0   ;;  %s672_s10 = smov 0  }
   0x4   :  { %s674_s11 = smov 0   ;;  %s676_s12 = smov 0  }
   0x5   :  { %s678_s13 = smov 0   ;;  %s680_s14 = smov 0  }
   0x6 LB: > { %s409_s15 = sadd.s32 4294967295, %s648_s14   ;;  %p75_p0 = scmp.ne.s32.totalorder %s632_s10, %s628_s9  ;;  %s648_s14 = sphi %s680_s14, %s17_s14   ;;  %s644_s13 = sphi %s678_s13, %s815_s13   ;;  %s640_s12 = sphi %s676_s12, %s814_s12   ;;  %s636_s11 = sphi %s674_s11, %s813_s11   ;;  %s632_s10 = sphi %s672_s10, %s812_s10   ;;  %s628_s9 = sphi %s670_s9, %s811_s9  }
   0x7   : > { %p702_p1 = scmp.eq.s32.totalorder %s409_s15, 0  ;;  %p410_p2 = scmp.ge.s32.totalorder %s648_s14, 1 }
   0x8   : > { %p112_p3 = scmp.lt.s32.totalorder %s648_s14, 3  ;;  %s126_s20 = sshll.u32 %s804_s0, 4  ;;  %s127_s20 = int_to_ptr.hbm [resolvable:$true] %s126_s20 }
   0x9   : > { %p710_p4 = por %p702_p1, %p75_p0  ;;  %s650_s22 = smov [#allocation6]  }
   0xa   : > { %p717_p5 = pnand %p410_p2, %p112_p3  ;;  %s128_s23 = sshll.u32 %s650_s22, 4  ;;  %s129_s23 = int_to_ptr.vmem [resolvable:$true] %s128_s23 }
   0xb   : > { %s26_s24 = sadd.s32 1, %s644_s13  ;;  %p69_p9 = scmp.ne.s32.totalorder %s636_s11, %s632_s10 }
   0xc   : > { %p439_p6 = pneg %p717_p5  ;;  %p27_p8 = scmp.ge.s32.totalorder %s26_s24, 2 }
   0xd   : > { %p70_p10 = scmp.eq.s32.totalorder %s648_s14, 0  ;;  %s62_s25 = sadd.s32 1, %s636_s11 }
   0xe   : > { %p440_p7 = pnand %p439_p6, %p702_p1  ;;  %s817_s24 = smov (%p27_p8, %s26_s24), 0 }
   0xf   : > { %p732_p11 = por %p70_p10, %p69_p9  ;;  %s59_s27 = ssub.s32 %s644_s13, %s817_s24 }
  0x10   : > { %442 = dma.hbm_to_vmem [thread:$0]  (!%p440_p7), %s127_s20, 128, %s129_s23, [#allocation7]  }
  0x11   : > { %s139_s28 = sand.u32 1, %s636_s11   ;;  %p60_p12 = scmp.eq.s32.totalorder %s59_s27, 0 }
  0x12   : > { %p448_p13 = scmp.lt.s32.totalorder %s648_s14, 2  ;;  %s413_s29 = sshll.u32 %s139_s28, 3 }
  0x13   : > { %s414_s30 = sshll.u32 %s644_s13, 3  ;;  %s143_s8 = scalar_lea.vmem [#allocation9], %s413_s29 }
  0x14   : > { %s742_s3 = scalar_select %p60_p12, %s636_s11, %s62_s25  }
  0x15   : > { %s147_s6 = scalar_lea.hbm %s805_s1, %s414_s30  ;;  %s151_s9 = sshll.u32 %s143_s8, 4  ;;  %s152_s9 = int_to_ptr.vmem [resolvable:$true] %s151_s9 }
  0x16   : > { %s149_s7 = sshll.u32 %s147_s6, 4  ;;  %p444_p0 = pnand %p448_p13, %p732_p11  ;;  %s150_s7 = int_to_ptr.hbm [resolvable:$true] %s149_s7 }
  0x17   : > { %s140_s18 = scalar_lea.sflag [#allocation10], %s139_s28  ;;  %160 = sbr.rel (%p717_p5) target bundleno = 1152 (0x480), region = 28 }
  0x18   : > { %446 = dma.hbm_to_vmem [thread:$0]  (!%p444_p0), %s150_s7, 128, %s152_s9, %s140_s18  }
  0x1c   : > { %615 = dma.done.wait (%p702_p1), [#allocation7], 128  }
  0x1d   : > { %617 = vsyncadd (%p702_p1), [#allocation7], 4294967168  ;;  %s167_s19 = sand.u32 1, %s632_s10  }
  0x1e   : > { %s756_s20 = sshll.u32 %s167_s19, 3  ;;  %s168_s22 = scalar_lea.sflag [#allocation10], %s167_s19 }
  0x1f   : > { %s171_s23 = scalar_lea.vmem [#allocation9], %s756_s20 }
  0x20   : > { %619 = dma.done.wait (%p710_p4), %s168_s22, 128  }
  0x21   : > { %621 = vsyncadd (%p710_p4), %s168_s22, 4294967168  ;;  %p418_p2 = scmp.ne.s32.totalorder %s640_s12, 0 }
  0x23   : > { %191 = sbr.rel (%p418_p2) target bundleno = 185 (0xb9), region = 40 }
  0x28   : > { %v192_v0 = vld [vmem:[#allocation6] sm:$0xff]  ;;  %vm194_vm0 = vcmask 261120   ;;  %vm212_vm1 = vcmask 7168   ;;  %v651_v3 = vmov -1e+30   ;;  %v652_v4 = vmov 0.0  }
  0x29   : > { %v193_v1 = vmul.f32 %v192_v0, %v192_v0  ;;  %213 = vst.msk [vmem:[#allocation3] sm:$0xff] %vm212_vm1, %v651_v3 }
  0x2a   : > { %214 = vst.msk [vmem:[#allocation4] sm:$0xff] %vm212_vm1, %v652_v4 }
  0x2b   : > { %v195_v2 = vsel %vm194_vm0, %v193_v1, 0.0  ;;  %215 = vst.msk [vmem:[#allocation5] sm:$0xff] %vm212_vm1, %v652_v4 }
  0x2c   : > { %196 = vadd.xlane.f32.xlu0 %v195_v2 }
  0x9f   : > { %v197_v5 = vpop.xlane.xlu0 %196 }
  0xa0   : > { %v198_v6 = vmax.f32 %v197_v5, 1e-24 }
  0xa2   : > { %505 = vrsqrt.f32 %v198_v6  ;;  %vm205_vm3 = vweird.f32 %v198_v6 }
  0xa8   : > { %v506_v7 = vpop.eup %505 }
  0xa9   : > { %v200_v8 = vmul.f32 %v506_v7, %v198_v6  ;;  %vm206_vm2 = vweird.f32 %v506_v7 }
  0xaa   : > { %vm207_vm4 = vmor %vm205_vm3, %vm206_vm2 }
  0xab   : > { %v201_v9 = vmul.f32 %v506_v7, %v200_v8 }
  0xad   : > { %v202_v10 = vmul.f32 0.5, %v201_v9 }
  0xaf   : > { %v203_v11 = vsub.f32 1.5, %v202_v10 }
  0xb1   : > { %v204_v12 = vmul.f32 %v506_v7, %v203_v11 }
  0xb3   : > { %v208_v13 = vsel %vm207_vm4, %v506_v7, %v204_v12 }
  0xb4   : > { %v209_v14 = vmul.f32 20.0, %v208_v13 }
  0xb6   : > { %v210_v15 = vmul.f32 %v209_v14, %v192_v0 }
  0xb8   : > { %211 = vst.msk [vmem:[#allocation2] sm:$0xff] %vm194_vm0, %v210_v15 }
  0xb9 PF: > { %v216_v16 = vld [vmem:[%s171_s23] sm:$0xff]  ;;  %vm218_vm5 = vcmask 261120  }
  0xba   : > { %v217_v17 = vmul.f32 %v216_v16, %v216_v16 }
  0xbc   : > { %v219_v18 = vsel %vm218_vm5, %v217_v17, 0.0 }
  0xbd   : > { %220 = vadd.xlane.f32.xlu0 %v219_v18 }
  0xbf   : > { %v234_v29 = vld [vmem:[#allocation2] sm:$0xff] }
 0x130   : > { %v221_v19 = vpop.xlane.xlu0 %220 }
 0x131   : > { %v222_v20 = vmax.f32 %v221_v19, 1e-24 }
 0x133   : > { %507 = vrsqrt.f32 %v222_v20  ;;  %vm229_vm7 = vweird.f32 %v222_v20 }
 0x139   : > { %v508_v21 = vpop.eup %507 }
 0x13a   : > { %v224_v22 = vmul.f32 %v508_v21, %v222_v20  ;;  %vm230_vm6 = vweird.f32 %v508_v21 }
 0x13b   : > { %vm231_vm8 = vmor %vm229_vm7, %vm230_vm6 }
 0x13c   : > { %v225_v23 = vmul.f32 %v508_v21, %v224_v22 }
 0x13e   : > { %v226_v24 = vmul.f32 0.5, %v225_v23 }
 0x140   : > { %v227_v25 = vsub.f32 1.5, %v226_v24 }
 0x142   : > { %v228_v26 = vmul.f32 %v508_v21, %v227_v25 }
 0x144   : > { %v232_v27 = vsel %vm231_vm8, %v508_v21, %v228_v26 }
 0x145   : > { %v233_v28 = vmul.f32 %v232_v27, %v216_v16 }
 0x147   : > { %419 = vmatpush.xpose.msk.msra.mxu0 %vm218_vm5, %v233_v28 }
 0x14a   : > { %420 = vmatmul.msk.f32.vlgmr.msra.gmra.mxu0 %vm218_vm5, %v234_v29 }
 0x1c3   : > { %264 = sbr.rel (%p418_p2) target bundleno = 580 (0x244), region = 44 }
 0x1c7   : > { %v258_v30 = vpop.f32.mrf.mxu0 }
 0x1c8   : > { %v265_v31 = vlaneseq  ;;  %vm271_vm9 = vcmask 64512   ;;  %vm275_vm11 = vcmask 7168  }
 0x1ca   : > { %v266_v32 = vshrl.u32 %v265_v31, 7  ;;  %v268_v33 = vand.u32 127, %v265_v31 }
 0x1cc   : > { %vm269_vm10 = vcmp.eq.s32.totalorder %v266_v32, %v268_v33 }
 0x1cd   : > { %v270_v34 = vsel %vm269_vm10, %v258_v30, 0.0 }
 0x1ce   : > { %v272_v35 = vsel %vm271_vm9, %v270_v34, 0.0 }
 0x1cf   : > { %273 = vadd.xlane.f32.xlu0 %v272_v35 }
 0x242   : > { %v274_v36 = vpop.xlane.xlu0 %273 }
 0x243   : > { %276 = vst.msk [vmem:[#allocation5] sm:$0xff] %vm275_vm11, %v274_v36 }
 0x244 PF: > { %vm278_vm12 = vcmask 64512   ;;  %v653_v38 = vmov 0   ;;  %v277_v39 = vld [vmem:[#allocation3] sm:$0xff]  ;;  %vm300_vm13 = vcmask 7168   ;;  %v286_v50 = vld [vmem:[#allocation4] sm:$0xff]  ;;  %p422_p1 = scmp.ne.s32.totalorder %s640_s12, 1 }
 0x245   : > { %v279_v37 = vsel %vm278_vm12, %v258_v30, -inf  ;;  %509 = vset.pattern.permute.xlu0 %v653_v38 }
 0x246   : > { %280 = vmax.xlane.f32.xlu0 %v279_v37 }
 0x2b9   : > { %v281_v40 = vpop.xlane.xlu0 %280 }
 0x2ba   : > { %v282_v41 = vmax.f32 %v277_v39, %v281_v40 }
 0x2bc   : > { %v283_v42 = vsub.f32 %v277_v39, %v282_v41  ;;  %302 = vst.msk [vmem:[#allocation3] sm:$0xff] %vm300_vm13, %v282_v41  ;;  %290 = vperm.xlu0 %509, %v282_v41  }
 0x2be   : > { %v284_v48 = vmul.f32 1.442695, %v283_v42 }
 0x32e   : > { %v291_v43 = vpop.permute.xlu0 %290 }
 0x32f   : > { %v293_v44 = vsub.f32 %v258_v30, %v291_v43 }
 0x331   : > { %v294_v45 = vmul.f32 1.442695, %v293_v44 }
 0x333   : > { %510 = vpow2.f32 %v294_v45 }
 0x334   : > { %512 = vpow2.f32 %v284_v48 }
 0x339   : > { %v511_v46 = vpop.eup %510 }
 0x33a   : > { %v296_v47 = vsel %vm278_vm12, %v511_v46, 0.0  ;;  %v513_v49 = vpop.eup %512 }
 0x33b   : > { %297 = vadd.xlane.f32.xlu1 %v296_v47  ;;  %v287_v51 = vmul.f32 %v513_v49, %v286_v50 }
 0x3ad   : > { %306 = sbr.rel (%p422_p1) target bundleno = 1146 (0x47a), region = 48 }
 0x3ae   : > { %v298_v52 = vpop.xlane.xlu1 %297 }
 0x3af   : > { %v299_v53 = vadd.f32 %v298_v52, %v287_v51 }
 0x3b1   : > { %301 = vst.msk [vmem:[#allocation4] sm:$0xff] %vm300_vm13, %v299_v53 }
 0x3b2   : > { %v307_v56 = vld [vmem:[#allocation3] sm:$0xff]  ;;  %v312_v58 = vld [vmem:[#allocation5] sm:$0xff] }
 0x3b8   : > { %v308_v54 = vld [vmem:[#allocation4] sm:$0xff] }
 0x3b9   : > { %514 = vlog2.f32 %v308_v54 }
 0x3bf   : > { %v515_v55 = vpop.eup %514 }
 0x3c0   : > { %v310_v57 = vmul.f32 0.6931472, %v515_v55 }
 0x3c2   : > { %v311_v59 = vadd.f32 %v310_v57, %v307_v56 }
 0x3c4   : > { %v313_v60 = vsub.f32 %v311_v59, %v312_v58 }
 0x3c6   : > { %v314_v61 = vsel %vm300_vm13, %v313_v60, 0.0 }
 0x3c7   : > { %315 = vadd.xlane.f32.xlu0 %v314_v61 }
 0x43a   : > { %v316_v62 = vpop.xlane.xlu0 %315 }
 0x43b   : > { %v317_v63 = vrot.slane %v316_v62, 4 }
 0x43d   : > { %v318_v0 = vadd.f32 %v317_v63, %v316_v62 }
 0x43f   : > { %v319_v1 = vrot.slane %v318_v0, 2 }
 0x441   : > { %v320_v2 = vadd.f32 %v319_v1, %v318_v0 }
 0x443   : > { %v321_v3 = vrot.slane %v320_v2, 1 }
 0x445   : > { %v322_v4 = vadd.f32 %v321_v3, %v320_v2 }
 0x447   : > { %427 = vpush %v322_v4 }
 0x478   : > { %s428_s12 = spop %427 }
 0x479   : > { %325 = sst [smem:[#allocation11]] %s428_s12 }
 0x47a PF: > { %p450_p3 = scmp.eq.s32.totalorder %s409_s15, 1  ;;  %s333_s21 = sshll.u32 %s806_s2, 4  ;;  %s334_s21 = int_to_ptr.hbm [resolvable:$true] %s333_s21 }
 0x47b   : > { %s654_s25 = smov [#allocation11]  }
 0x47c   : > { %436 = dma.smem_to_hbm (%p450_p3), %s654_s25, 16, %s334_s21, [#allocation8]  }
 0x47d   : > { %623 = dma.done.wait (%p450_p3), [#allocation8], 16  }
 0x47e   : > { %625 = vsyncadd (%p450_p3), [#allocation8], 4294967280 }
 0x47f   : > { %342 = sfence }
 0x480 PF: > { %s17_s14 = sadd.s32 1, %s648_s14   ;;  %s811_s9 = smov %s632_s10 }
 0x481   : > { %p14_p4 = scmp.ge.s32.totalorder %s17_s14, 4   ;;  %s812_s10 = smov %s636_s11 }
 0x482   : > { %s813_s11 = smov %s742_s3  ;;  %s814_s12 = smov %s644_s13 }
 0x483   : > { %s815_s13 = smov %s817_s24  ;;  %16 = sbr.rel (!%p14_p4) target bundleno = 6 (0x6), region = 85 }
 0x488   :  { %348 = vsyncpa [#allocation7], 1 }
 0x489   :  { %350 = vsyncpa [#allocation7 + $0x1], 1 }
 0x48a   :  { %351 = vsyncpa [#allocation10], 1 }
 0x48b   :  { %353 = vsyncpa [#allocation10 + $0x1], 1 }
 0x48c   :  { %354 = vsyncpa [#allocation8], 1 }
 0x48d   :  { %356 = vsyncpa [#allocation8 + $0x1], 1 }

</bundles_post_ra>
